<compile_context>
chip_gen: v7x
topology: tpu7x:2x2x1
jax: 0.10.0
libtpu: 0.0.40
codegen_flags: <defaults>
</compile_context>

<pallas_src>
import functools

import jax
import jax.numpy as jnp
from jax import lax
from jax.experimental import pallas as pl
from jax.experimental.pallas import tpu as pltpu

_LANES = 128            # vreg lane width
_ACC_ROWS = 64          # fixed accumulator / compute-chunk height (32 KiB f32)
_MAX_BLOCK_ROWS = 8192  # 8192 x 128 f32 = 4 MiB per input block per buffer


def _round_up(a, b):
    return -(-a // b) * b


def _bce_kernel(x_ref, y_ref, out_ref, acc_ref, *, n_total, block_rows,
                blocks_per_core, needs_mask):
    """Accumulate the elementwise-BCE sum over this core's row-blocks."""
    p = pl.program_id(0)              # core-split index ("parallel" axis)
    i = pl.program_id(1)              # row-block within this core ("arbitrary")
    last = pl.num_programs(1) - 1

    n_chunks = block_rows // _ACC_ROWS
    block_elems = block_rows * _LANES

    @pl.when(i == 0)
    def _():
        acc_ref[...] = jnp.zeros_like(acc_ref)

    def chunk_loss(c):
        # 64-row chunk keeps live intermediates small enough to stay in vregs.
        r0 = pl.multiple_of(c * _ACC_ROWS, _ACC_ROWS)
        x = x_ref[pl.ds(r0, _ACC_ROWS), :].astype(jnp.float32)
        y = y_ref[pl.ds(r0, _ACC_ROWS), :].astype(jnp.float32)
        # PyTorch BCELoss clamps each log term at -100 for stability.
        log_x = jnp.maximum(jnp.log(x), jnp.float32(-100.0))
        log_1mx = jnp.maximum(jnp.log(1.0 - x), jnp.float32(-100.0))
        # -(y*log(x) + (1-y)*log(1-x)), refactored to save VALU ops.
        return -(log_1mx + y * (log_x - log_1mx))

    def accumulate(limit):
        # limit is None for full blocks, else the number of valid elements in
        # this block (a traced scalar; may be <= 0 for duplicated blocks).
        def body(c, carry):
            loss = chunk_loss(c)
            if limit is not None:
                row = lax.broadcasted_iota(jnp.int32, loss.shape, 0)
                col = lax.broadcasted_iota(jnp.int32, loss.shape, 1)
                flat = (c * _ACC_ROWS + row) * _LANES + col
                loss = jnp.where(flat < limit, loss, jnp.float32(0.0))
            acc_ref[...] += loss
            return carry
        lax.fori_loop(0, n_chunks, body, 0)

    if needs_mask:
        b = p * blocks_per_core + i              # flat row-block index
        valid = n_total - b * block_elems        # valid elements in this block

        @pl.when(valid >= block_elems)           # full block: unmasked fast path
        def _():
            accumulate(None)

        @pl.when(valid < block_elems)            # ragged / duplicated block
        def _():
            accumulate(valid)
    else:
        accumulate(None)

    @pl.when(i == last)
    def _():
        # Fold the (64, 128) accumulator to a lane-dense (8, 128) partial-sum
        # slab with 7 VPU adds; the wrapper's jnp.sum finishes the reduction.
        folded = acc_ref[0:8, :]
        for g in range(1, _ACC_ROWS // 8):
            folded = folded + acc_ref[g * 8:(g + 1) * 8, :]
        out_ref[...] = folded


def bce_loss_pallas(inputs, targets, weight=None, reduction="mean"):
    """Weighted BCE loss (scalar weight), matching torch.nn.BCELoss semantics."""
    assert reduction in ("mean", "sum")

    x = jnp.ravel(inputs)   # keep native dtype; cast happens inside the kernel
    y = jnp.ravel(targets)
    n = x.shape[0]
    assert n > 0

    rows = -(-n // _LANES)
    n_round = rows * _LANES
    if n_round != n:
        # Pad only to make the (rows, 128) reshape legal; the in-kernel element
        # mask makes the pad values irrelevant.
        # TODO(synk): lane-unaligned sizes still pay one extra HBM copy here.
        x = jnp.pad(x, (0, n_round - n))
        y = jnp.pad(y, (0, n_round - n))
    x = x.reshape(rows, _LANES)
    y = y.reshape(rows, _LANES)

    block_rows = min(_MAX_BLOCK_ROWS, _round_up(rows, _ACC_ROWS))
    block_elems = block_rows * _LANES
    num_blocks = -(-rows // block_rows)
    num_splits = 2 if num_blocks >= 2 else 1          # dual TensorCore on v7x
    blocks_per_core = -(-num_blocks // num_splits)
    needs_mask = (n % block_elems != 0) or (num_splits * blocks_per_core != num_blocks)

    def in_map(p, i):
        # Clamp so an odd-split duplicated block re-reads a valid block; its
        # contribution is zeroed by the in-kernel element mask.
        return (jnp.minimum(p * blocks_per_core + i, num_blocks - 1), 0)

    kernel = functools.partial(
        _bce_kernel,
        n_total=n,
        block_rows=block_rows,
        blocks_per_core=blocks_per_core,
        needs_mask=needs_mask,
    )

    partials = pl.pallas_call(
        kernel,
        out_shape=jax.ShapeDtypeStruct((num_splits * 8, _LANES), jnp.float32),
        grid=(num_splits, blocks_per_core),
        in_specs=[
            pl.BlockSpec((block_rows, _LANES), in_map),   # predictions
            pl.BlockSpec((block_rows, _LANES), in_map),   # targets
        ],
        out_specs=pl.BlockSpec((8, _LANES), lambda p, i: (p, 0)),
        scratch_shapes=[pltpu.VMEM((_ACC_ROWS, _LANES), jnp.float32)],
        compiler_params=pltpu.CompilerParams(
            dimension_semantics=("parallel", "arbitrary"),
            vmem_limit_bytes=40 * 1024 * 1024,
        ),
        cost_estimate=pl.CostEstimate(
            flops=10 * n,
            transcendentals=2 * n,
            bytes_accessed=int(x.nbytes) + int(y.nbytes) + num_splits * 8 * _LANES * 4,
        ),
    )(x, y)

    total = jnp.sum(partials)
    w = jnp.float32(1.0) if weight is None else jnp.asarray(weight, jnp.float32)
    total = total * w
    if reduction == "mean":
        total = total / jnp.float32(n)
    return total


if __name__ == "__main__":
    key = jax.random.PRNGKey(0)
    k1, k2 = jax.random.split(key)

    # Small NCHW-like shape; the module flattens everything anyway.
    shape = (2, 4, 16, 16)
    # Predictions must be probabilities in (0, 1) for BCELoss.
    preds = jax.nn.sigmoid(jax.random.normal(k1, shape, dtype=jnp.float32))
    # Binary targets.
    targets = (jax.random.uniform(k2, shape) > 0.5).astype(jnp.float32)

    weight = 0.7          # deterministic scalar weight (self.weight)
    reduction = "mean"

    loss = bce_loss_pallas(preds, targets, weight, reduction=reduction)
    loss = jax.block_until_ready(loss)

    # Reference check in plain JAX (mirrors torch.nn.BCELoss semantics).
    xr = preds.reshape(-1)
    yr = targets.reshape(-1)
    ref = -(yr * jnp.maximum(jnp.log(xr), -100.0)
            + (1.0 - yr) * jnp.maximum(jnp.log(1.0 - xr), -100.0)) * weight
    ref = ref.mean() if reduction == "mean" else ref.sum()

    assert jnp.allclose(loss, ref, rtol=1e-5, atol=1e-6), (loss, ref)
    print("KERNEL_OK")
</pallas_src>

<mosaic_0001>
module attributes {stable_mosaic.version = 11 : i64} {
  func.func @_bce_kernel(%arg0: i32, %arg1: i32, %arg2: memref<64x128xf32, #tpu.memory_space<vmem>>, %arg3: memref<64x128xf32, #tpu.memory_space<vmem>>, %arg4: memref<8x128xf32, #tpu.memory_space<vmem>>, %arg5: memref<64x128xf32, #tpu.memory_space<vmem>>) attributes {dimension_semantics = [#tpu.dimension_semantics<parallel>, #tpu.dimension_semantics<arbitrary>], iteration_bounds = array<i64: 1, 1>, scalar_prefetch = 0 : i64, scratch_operands = 1 : i64, tpu.core_type = #tpu.core_type<tc>, window_params = [{transform_indices = @transform_0, window_bounds = array<i64: 64, 128>}, {transform_indices = @transform_1, window_bounds = array<i64: 64, 128>}, {transform_indices = @transform_2, window_bounds = array<i64: 8, 128>}]} {
    %c0_i32 = arith.constant 0 : i32
    %0 = arith.cmpi eq, %arg1, %c0_i32 : i32
    %1 = arith.extui %0 : i1 to i32
    %c0_i32_0 = arith.constant 0 : i32
    %2 = arith.cmpi ne, %1, %c0_i32_0 : i32
    scf.if %2 {
      %cst = arith.constant 0.000000e+00 : f32
      %16 = vector.broadcast %cst : f32 to vector<64x128xf32>
      %c0 = arith.constant 0 : index
      %c0_7 = arith.constant 0 : index
      %17 = vector.load %arg5[%c0, %c0_7] : memref<64x128xf32, #tpu.memory_space<vmem>>, vector<64x128xf32>
      tpu.vector_store %arg5[%c0, %c0_7], %16 {strides = array<i32>} : memref<64x128xf32, #tpu.memory_space<vmem>>, vector<64x128xf32>,
    } else {
    }
    %c1_i32 = arith.constant 1 : i32
    %3 = arith.muli %arg0, %c1_i32 : i32
    %4 = arith.addi %3, %arg1 : i32
    %c8192_i32 = arith.constant 8192 : i32
    %5 = arith.muli %4, %c8192_i32 : i32
    %c2048_i32 = arith.constant 2048 : i32
    %6 = arith.subi %c2048_i32, %5 : i32
    %c8192_i32_1 = arith.constant 8192 : i32
    %7 = arith.cmpi sge, %6, %c8192_i32_1 : i32
    %8 = arith.extui %7 : i1 to i32
    %c0_i32_2 = arith.constant 0 : i32
    %9 = arith.cmpi ne, %8, %c0_i32_2 : i32
    scf.if %9 {
      %c0_i32_7 = arith.constant 0 : i32
      %c64_i32 = arith.constant 64 : i32
      %16 = arith.muli %c0_i32_7, %c64_i32 : i32
      %17 = tpu.assume_multiple %16, 64 : i32
      %18 = arith.index_cast %17 : i32 to index
      %c0 = arith.constant 0 : index
      %19 = vector.load %arg2[%18, %c0] : memref<64x128xf32, #tpu.memory_space<vmem>>, vector<64x128xf32>
      %20 = arith.index_cast %17 : i32 to index
      %c0_8 = arith.constant 0 : index
      %21 = vector.load %arg3[%20, %c0_8] : memref<64x128xf32, #tpu.memory_space<vmem>>, vector<64x128xf32>
      %22 = math.log %19 : vector<64x128xf32>
      %cst = arith.constant -1.000000e+02 : f32
      %23 = vector.broadcast %cst : f32 to vector<64x128xf32>
      %24 = arith.maximumf %22, %23 : vector<64x128xf32>
      %cst_9 = arith.constant 1.000000e+00 : f32
      %25 = vector.broadcast %cst_9 : f32 to vector<64x128xf32>
      %26 = arith.subf %25, %19 : vector<64x128xf32>
      %27 = math.log %26 : vector<64x128xf32>
      %cst_10 = arith.constant -1.000000e+02 : f32
      %28 = vector.broadcast %cst_10 : f32 to vector<64x128xf32>
      %29 = arith.maximumf %27, %28 : vector<64x128xf32>
      %30 = arith.subf %24, %29 : vector<64x128xf32>
      %31 = arith.mulf %21, %30 : vector<64x128xf32>
      %32 = arith.addf %29, %31 : vector<64x128xf32>
      %cst_11 = arith.constant 0.000000e+00 : f32
      %33 = vector.broadcast %cst_11 : f32 to vector<64x128xf32>
      %34 = arith.subf %33, %32 : vector<64x128xf32>
      %c0_12 = arith.constant 0 : index
      %c0_13 = arith.constant 0 : index
      %35 = vector.load %arg5[%c0_12, %c0_13] : memref<64x128xf32, #tpu.memory_space<vmem>>, vector<64x128xf32>
      %36 = arith.addf %35, %34 : vector<64x128xf32>
      %c0_14 = arith.constant 0 : index
      %c0_15 = arith.constant 0 : index
      %37 = vector.load %arg5[%c0_14, %c0_15] : memref<64x128xf32, #tpu.memory_space<vmem>>, vector<64x128xf32>
      tpu.vector_store %arg5[%c0_14, %c0_15], %36 {strides = array<i32>} : memref<64x128xf32, #tpu.memory_space<vmem>>, vector<64x128xf32>,
      %c1_i32_16 = arith.constant 1 : i32
    } else {
    }
    %c8192_i32_3 = arith.constant 8192 : i32
    %10 = arith.cmpi slt, %6, %c8192_i32_3 : i32
    %11 = arith.extui %10 : i1 to i32
    %c0_i32_4 = arith.constant 0 : i32
    %12 = arith.cmpi ne, %11, %c0_i32_4 : i32
    scf.if %12 {
      %c0_i32_7 = arith.constant 0 : i32
      %c64_i32 = arith.constant 64 : i32
      %16 = arith.muli %c0_i32_7, %c64_i32 : i32
      %17 = tpu.assume_multiple %16, 64 : i32
      %18 = arith.index_cast %17 : i32 to index
      %c0 = arith.constant 0 : index
      %19 = vector.load %arg2[%18, %c0] : memref<64x128xf32, #tpu.memory_space<vmem>>, vector<64x128xf32>
      %20 = arith.index_cast %17 : i32 to index
      %c0_8 = arith.constant 0 : index
      %21 = vector.load %arg3[%20, %c0_8] : memref<64x128xf32, #tpu.memory_space<vmem>>, vector<64x128xf32>
      %22 = math.log %19 : vector<64x128xf32>
      %cst = arith.constant -1.000000e+02 : f32
      %23 = vector.broadcast %cst : f32 to vector<64x128xf32>
      %24 = arith.maximumf %22, %23 : vector<64x128xf32>
      %cst_9 = arith.constant 1.000000e+00 : f32
      %25 = vector.broadcast %cst_9 : f32 to vector<64x128xf32>
      %26 = arith.subf %25, %19 : vector<64x128xf32>
      %27 = math.log %26 : vector<64x128xf32>
      %cst_10 = arith.constant -1.000000e+02 : f32
      %28 = vector.broadcast %cst_10 : f32 to vector<64x128xf32>
      %29 = arith.maximumf %27, %28 : vector<64x128xf32>
      %30 = arith.subf %24, %29 : vector<64x128xf32>
      %31 = arith.mulf %21, %30 : vector<64x128xf32>
      %32 = arith.addf %29, %31 : vector<64x128xf32>
      %cst_11 = arith.constant 0.000000e+00 : f32
      %33 = vector.broadcast %cst_11 : f32 to vector<64x128xf32>
      %34 = arith.subf %33, %32 : vector<64x128xf32>
      %35 = tpu.iota {dimensions = array<i32: 0>} : vector<64x128xi32>
      %36 = tpu.iota {dimensions = array<i32: 1>} : vector<64x128xi32>
      %c64_i32_12 = arith.constant 64 : i32
      %37 = arith.muli %c0_i32_7, %c64_i32_12 : i32
      %38 = vector.broadcast %37 : i32 to vector<64x128xi32>
      %39 = arith.addi %38, %35 : vector<64x128xi32>
      %c128_i32 = arith.constant 128 : i32
      %40 = vector.broadcast %c128_i32 : i32 to vector<64x128xi32>
      %41 = arith.muli %39, %40 : vector<64x128xi32>
      %42 = arith.addi %41, %36 : vector<64x128xi32>
      %43 = vector.broadcast %6 : i32 to vector<64x128xi32>
      %44 = arith.cmpi slt, %42, %43 : vector<64x128xi32>
      %cst_13 = arith.constant 0.000000e+00 : f32
      %45 = vector.broadcast %cst_13 : f32 to vector<64x128xf32>
      %46 = arith.select %44, %34, %45 : vector<64x128xi1>, vector<64x128xf32>
      %c0_14 = arith.constant 0 : index
      %c0_15 = arith.constant 0 : index
      %47 = vector.load %arg5[%c0_14, %c0_15] : memref<64x128xf32, #tpu.memory_space<vmem>>, vector<64x128xf32>
      %48 = arith.addf %47, %46 : vector<64x128xf32>
      %c0_16 = arith.constant 0 : index
      %c0_17 = arith.constant 0 : index
      %49 = vector.load %arg5[%c0_16, %c0_17] : memref<64x128xf32, #tpu.memory_space<vmem>>, vector<64x128xf32>
      tpu.vector_store %arg5[%c0_16, %c0_17], %48 {strides = array<i32>} : memref<64x128xf32, #tpu.memory_space<vmem>>, vector<64x128xf32>,
      %c1_i32_18 = arith.constant 1 : i32
    } else {
    }
    %c0_i32_5 = arith.constant 0 : i32
    %13 = arith.cmpi eq, %arg1, %c0_i32_5 : i32
    %14 = arith.extui %13 : i1 to i32
    %c0_i32_6 = arith.constant 0 : i32
    %15 = arith.cmpi ne, %14, %c0_i32_6 : i32
    scf.if %15 {
      %c0 = arith.constant 0 : index
      %c0_7 = arith.constant 0 : index
      %16 = vector.load %arg5[%c0, %c0_7] : memref<64x128xf32, #tpu.memory_space<vmem>>, vector<8x128xf32>
      %c8 = arith.constant 8 : index
      %c0_8 = arith.constant 0 : index
      %17 = vector.load %arg5[%c8, %c0_8] : memref<64x128xf32, #tpu.memory_space<vmem>>, vector<8x128xf32>
      %18 = arith.addf %16, %17 : vector<8x128xf32>
      %c16 = arith.constant 16 : index
      %c0_9 = arith.constant 0 : index
      %19 = vector.load %arg5[%c16, %c0_9] : memref<64x128xf32, #tpu.memory_space<vmem>>, vector<8x128xf32>
      %20 = arith.addf %18, %19 : vector<8x128xf32>
      %c24 = arith.constant 24 : index
      %c0_10 = arith.constant 0 : index
      %21 = vector.load %arg5[%c24, %c0_10] : memref<64x128xf32, #tpu.memory_space<vmem>>, vector<8x128xf32>
      %22 = arith.addf %20, %21 : vector<8x128xf32>
      %c32 = arith.constant 32 : index
      %c0_11 = arith.constant 0 : index
      %23 = vector.load %arg5[%c32, %c0_11] : memref<64x128xf32, #tpu.memory_space<vmem>>, vector<8x128xf32>
      %24 = arith.addf %22, %23 : vector<8x128xf32>
      %c40 = arith.constant 40 : index
      %c0_12 = arith.constant 0 : index
      %25 = vector.load %arg5[%c40, %c0_12] : memref<64x128xf32, #tpu.memory_space<vmem>>, vector<8x128xf32>
      %26 = arith.addf %24, %25 : vector<8x128xf32>
      %c48 = arith.constant 48 : index
      %c0_13 = arith.constant 0 : index
      %27 = vector.load %arg5[%c48, %c0_13] : memref<64x128xf32, #tpu.memory_space<vmem>>, vector<8x128xf32>
      %28 = arith.addf %26, %27 : vector<8x128xf32>
      %c56 = arith.constant 56 : index
      %c0_14 = arith.constant 0 : index
      %29 = vector.load %arg5[%c56, %c0_14] : memref<64x128xf32, #tpu.memory_space<vmem>>, vector<8x128xf32>
      %30 = arith.addf %28, %29 : vector<8x128xf32>
      %c0_15 = arith.constant 0 : index
      %c0_16 = arith.constant 0 : index
      %31 = vector.load %arg4[%c0_15, %c0_16] : memref<8x128xf32, #tpu.memory_space<vmem>>, vector<8x128xf32>
      tpu.vector_store %arg4[%c0_15, %c0_16], %30 {strides = array<i32>} : memref<8x128xf32, #tpu.memory_space<vmem>>, vector<8x128xf32>,
    } else {
    }
    return
  }
  func.func @transform_0(%arg0: i32, %arg1: i32) -> (i32, i32) {
    %c1_i32 = arith.constant 1 : i32
    %0 = arith.muli %arg0, %c1_i32 : i32
    %1 = arith.addi %0, %arg1 : i32
    %c0_i32 = arith.constant 0 : i32
    %2 = arith.minsi %1, %c0_i32 : i32
    %c0_i32_0 = arith.constant 0 : i32
    %c0_i32_1 = arith.constant 0 : i32
    return %2, %c0_i32_0 : i32, i32
  }
  func.func @transform_1(%arg0: i32, %arg1: i32) -> (i32, i32) {
    %c1_i32 = arith.constant 1 : i32
    %0 = arith.muli %arg0, %c1_i32 : i32
    %1 = arith.addi %0, %arg1 : i32
    %c0_i32 = arith.constant 0 : i32
    %2 = arith.minsi %1, %c0_i32 : i32
    %c0_i32_0 = arith.constant 0 : i32
    %c0_i32_1 = arith.constant 0 : i32
    return %2, %c0_i32_0 : i32, i32
  }
  func.func @transform_2(%arg0: i32, %arg1: i32) -> (i32, i32) {
    %c0_i32 = arith.constant 0 : i32
    %c0_i32_0 = arith.constant 0 : i32
    return %arg0, %c0_i32 : i32, i32
  }
}

</mosaic_0001>

<bundles_post_ra>
// kernel: tpu_custom_call.1
= control target key start
LH: loop header
LB: loop body
LE: loop exit
PB: predicated region body
PF: predicated region fallthrough
CT: control target
= control target key end

     0   :  { %7 = vsyncpa [#allocation4], 0  ;;  %s645_s0 = inlined_call_operand.hbm [shape: f32[16,128], index: 0, kind: input, shape index: {}]   ;;  %s646_s1 = inlined_call_operand.hbm [shape: f32[16,128], index: 1, kind: input, shape index: {}]   ;;  %s647_s2 = inlined_call_operand.hbm [shape: f32[8,128], index: 2, kind: output, shape index: {}]  }
   0x1   :  { %8 = vsyncpa [#allocation7], 0 }
   0x2   :  { %9 = vsyncpa [#allocation5], 0 }
   0x3   :  { %20 = vsyncadd [#allocation4], 768  ;;  %s543_s9 = smov [#allocation3]   ;;  %s471_s13 = scalar_lea.hbm %s645_s0, 256 }
   0x4   :  { %s25_s10 = sshll.u32 %s543_s9, 4  ;;  %p472_p0 = scmp.ne.s32.totalorder %s645_s0, %s471_s13  ;;  %s26_s10 = int_to_ptr.vmem [resolvable:$true] %s25_s10 }
   0x5   :  { %p475_p1 = scmp.lt.u32.totalorder %s471_s13, %s645_s0 }
   0x7   :  { %p477_p2 = pnand %p475_p1, %p472_p0 }
   0x9   :  { %480 = shalt.err (!%p477_p2)
}
   0xa   :  { %s481_s18 = scalar_lea.vmem %s26_s10, 256  ;;  %s485_s19 = scalar_lea.vmem %s26_s10, 1024 }
   0xb   :  { %p482_p3 = scmp.ne.s32.totalorder %s26_s10, %s481_s18  ;;  %p486_p4 = scmp.lt.s32.totalorder %s26_s10, %s26_s10 }
   0xc   :  { %p487_p5 = scmp.lt.s32.totalorder %s485_s19, %s481_s18 }
   0xe   :  { %p488_p6 = por %p487_p5, %p486_p4 }
  0x10   :  { %p489_p7 = pnand %p488_p6, %p482_p3 }
  0x12   :  { %492 = shalt.err (!%p489_p7)
}
  0x13   :  { %s544_s20 = smov 128   ;;  %s545_s21 = smov 8  }
  0x14   :  { %31 = dma.hbm_to_vmem [thread:$0]  %s645_s0, 256, %s26_s10, [#allocation4], %s544_s20, %s544_s20, %s545_s21  }
  0x15   :  { %42 = vsyncadd [#allocation7], 768  ;;  %s546_s24 = smov [#allocation6]   ;;  %s493_s28 = scalar_lea.hbm %s646_s1, 256 }
  0x16   :  { %s47_s25 = sshll.u32 %s546_s24, 4  ;;  %p494_p8 = scmp.ne.s32.totalorder %s646_s1, %s493_s28  ;;  %s48_s25 = int_to_ptr.vmem [resolvable:$true] %s47_s25 }
  0x17   :  { %p497_p9 = scmp.lt.u32.totalorder %s493_s28, %s646_s1 }
  0x19   :  { %p499_p10 = pnand %p497_p9, %p494_p8 }
  0x1b   :  { %502 = shalt.err (!%p499_p10)
}
  0x1c   :  { %s503_s5 = scalar_lea.vmem %s48_s25, 256  ;;  %s507_s0 = scalar_lea.vmem %s48_s25, 1024 }
  0x1d   :  { %p504_p11 = scmp.ne.s32.totalorder %s48_s25, %s503_s5  ;;  %p508_p12 = scmp.lt.s32.totalorder %s48_s25, %s48_s25 }
  0x1e   :  { %p509_p13 = scmp.lt.s32.totalorder %s507_s0, %s503_s5 }
  0x20   :  { %p510_p0 = por %p509_p13, %p508_p12 }
  0x22   :  { %p511_p1 = pnand %p510_p0, %p504_p11 }
  0x24   :  { %514 = shalt.err (!%p511_p1)
}
  0x25   :  { %53 = dma.hbm_to_vmem [thread:$0]  %s646_s1, 256, %s48_s25, [#allocation7], %s544_s20, %s544_s20, %s545_s21  }
  0x26   :  { %537 = dma.done.wait [#allocation4], 1024  }
  0x27   :  { %538 = vsyncadd [#allocation4], 4294966272 }
  0x28   :  { %539 = dma.done.wait [#allocation7], 1024  }
  0x29   :  { %540 = vsyncadd [#allocation7], 4294966272  ;;  %v223_v0 = vld [vmem:[#allocation3] sm:$0xff]  ;;  %v224_v1 = vld [vmem:[#allocation3 + $0x8] sm:$0xff]  ;;  %v327_v2 = vlaneseq  ;;  %s547_s1 = smov [#allocation8]  }
  0x2a   :  { %439 = vlog2.f32 %v223_v0  ;;  %v225_v3 = vld [vmem:[#allocation3 + $0x10] sm:$0xff]  ;;  %v226_v4 = vld [vmem:[#allocation3 + $0x18] sm:$0xff]  ;;  %v227_v5 = vld [vmem:[#allocation3 + $0x20] sm:$0xff]  ;;  %v263_v7 = vsub.f32 1.0, %v223_v0  ;;  %v264_v10 = vsub.f32 1.0, %v224_v1  ;;  %s420_s8 = sshll.u32 %s547_s1, 4  ;;  %s421_s8 = int_to_ptr.vmem [resolvable:$true] %s420_s8 }
  0x2b   :  { %441 = vlog2.f32 %v224_v1  ;;  %v228_v6 = vld [vmem:[#allocation3 + $0x28] sm:$0xff]  ;;  %v328_v8 = vshrl.u32 %v327_v2, 7  ;;  %v229_v9 = vld [vmem:[#allocation3 + $0x30] sm:$0xff]  ;;  %v230_v11 = vld [vmem:[#allocation3 + $0x38] sm:$0xff]  ;;  %v265_v12 = vsub.f32 1.0, %v225_v3  ;;  %v266_v13 = vsub.f32 1.0, %v226_v4  ;;  %p520_p3 = scmp.lt.s32.totalorder %s421_s8, %s421_s8 }
  0x2c   :  { %443 = vlog2.f32 %v225_v3  ;;  %v267_v14 = vsub.f32 1.0, %v227_v5  ;;  %v268_v16 = vsub.f32 1.0, %v228_v6  ;;  %v269_v20 = vsub.f32 1.0, %v229_v9  ;;  %s515_s9 = scalar_lea.vmem %s421_s8, 128 }
  0x2d   :  { %445 = vlog2.f32 %v226_v4  ;;  %v329_v15 = vadd.s32 8, %v328_v8  ;;  %v330_v17 = vadd.s32 16, %v328_v8  ;;  %v331_v18 = vadd.s32 24, %v328_v8  ;;  %p516_p2 = scmp.ne.s32.totalorder %s421_s8, %s515_s9  ;;  %p521_p4 = scmp.lt.s32.totalorder %s515_s9, %s515_s9 }
  0x2e   :  { %447 = vlog2.f32 %v227_v5  ;;  %v332_v21 = vadd.s32 32, %v328_v8  ;;  %v333_v22 = vadd.s32 40, %v328_v8  ;;  %v270_v24 = vsub.f32 1.0, %v230_v11 }
  0x2f   :  { %449 = vlog2.f32 %v228_v6  ;;  %v334_v25 = vadd.s32 48, %v328_v8  ;;  %v587_v26 = vand.u32 127, %v327_v2  ;;  %v589_v28 = vadd.s32 56, %v328_v8  ;;  %v231_v6 = vld [vmem:[#allocation6] sm:$0xff]  ;;  %p522_p5 = por %p521_p4, %p520_p3 }
  0x30   :  { %451 = vlog2.f32 %v229_v9  ;;  %v338_v29 = vmul.u32 128, %v328_v8  ;;  %v339_v30 = vmul.u32 128, %v329_v15 }
  0x31   :  { %453 = vlog2.f32 %v230_v11  ;;  %v340_v32 = vmul.u32 128, %v330_v17  ;;  %v341_v33 = vmul.u32 128, %v331_v18  ;;  %v233_v18 = vld [vmem:[#allocation6 + $0x10] sm:$0xff]  ;;  %p523_p6 = pnand %p522_p5, %p516_p2 }
  0x32   :  { %455 = vlog2.f32 %v263_v7  ;;  %v342_v35 = vmul.u32 128, %v332_v21  ;;  %v343_v36 = vmul.u32 128, %v333_v22  ;;  %v593_v43 = vadd.s32 %v338_v29, %v587_v26 }
  0x33   :  { %457 = vlog2.f32 %v264_v10  ;;  %v344_v39 = vmul.u32 128, %v334_v25  ;;  %v345_v42 = vmul.u32 128, %v589_v28  ;;  %v596_v44 = vadd.s32 %v339_v30, %v587_v26 }
  0x34   :  { %v440_v19 = vpop.eup %439  ;;  %459 = vlog2.f32 %v265_v12  ;;  %v599_v48 = vadd.s32 %v340_v32, %v587_v26  ;;  %v602_v49 = vadd.s32 %v341_v33, %v587_v26  ;;  %v605_v53 = vadd.s32 %v342_v35, %v587_v26  ;;  %v232_v12 = vld [vmem:[#allocation6 + $0x8] sm:$0xff] }
  0x35   :  { %v442_v23 = vpop.eup %441  ;;  %461 = vlog2.f32 %v266_v13  ;;  %v240_v38 = vmul.f32 0.6931472, %v440_v19  ;;  %v608_v54 = vadd.s32 %v343_v36, %v587_v26  ;;  %v611_v59 = vadd.s32 %v344_v39, %v587_v26  ;;  %v236_v36 = vld [vmem:[#allocation6 + $0x28] sm:$0xff] }
  0x36   :  { %v444_v27 = vpop.eup %443  ;;  %463 = vlog2.f32 %v267_v14  ;;  %v242_v41 = vmul.f32 0.6931472, %v442_v23  ;;  %vm355_vm0 = vcmp.lt.s32.totalorder %v593_v43, 2048  ;;  %vm356_vm1 = vcmp.lt.s32.totalorder %v596_v44, 2048 }
  0x37   :  { %v446_v31 = vpop.eup %445  ;;  %465 = vlog2.f32 %v268_v16  ;;  %v244_v46 = vmul.f32 0.6931472, %v444_v27  ;;  %v255_v57 = vmax.f32 %v240_v38, -100.0  ;;  %vm357_vm2 = vcmp.lt.s32.totalorder %v599_v48, 2048 }
  0x38   :  { %v448_v34 = vpop.eup %447  ;;  %467 = vlog2.f32 %v269_v20  ;;  %v246_v47 = vmul.f32 0.6931472, %v446_v31  ;;  %v256_v62 = vmax.f32 %v242_v41, -100.0  ;;  %vm358_vm3 = vcmp.lt.s32.totalorder %v602_v49, 2048  ;;  %v235_v31 = vld [vmem:[#allocation6 + $0x20] sm:$0xff]  ;;  %v237_v41 = vld [vmem:[#allocation6 + $0x30] sm:$0xff] }
  0x39   :  { %v450_v37 = vpop.eup %449  ;;  %469 = vlog2.f32 %v270_v24  ;;  %v248_v51 = vmul.f32 0.6931472, %v448_v34  ;;  %v257_v1 = vmax.f32 %v244_v46, -100.0  ;;  %v234_v24 = vld [vmem:[#allocation6 + $0x18] sm:$0xff]  ;;  %vm359_vm4 = vcmp.lt.s32.totalorder %v605_v53, 2048 }
  0x3a   :  { %v452_v40 = vpop.eup %451  ;;  %v250_v52 = vmul.f32 0.6931472, %v450_v37  ;;  %v258_v2 = vmax.f32 %v246_v47, -100.0  ;;  %v353_v43 = vadd.s32 %v345_v42, %v587_v26  ;;  %vm360_vm5 = vcmp.lt.s32.totalorder %v608_v54, 2048 }
  0x3b   :  { %v454_v45 = vpop.eup %453  ;;  %v252_v56 = vmul.f32 0.6931472, %v452_v40  ;;  %v259_v7 = vmax.f32 %v248_v51, -100.0  ;;  %v238_v51 = vld [vmem:[#allocation6 + $0x38] sm:$0xff]  ;;  %vm361_vm6 = vcmp.lt.s32.totalorder %v611_v59, 2048 }
  0x3c   :  { %v456_v50 = vpop.eup %455  ;;  %v254_v61 = vmul.f32 0.6931472, %v454_v45  ;;  %v260_v8 = vmax.f32 %v250_v52, -100.0  ;;  %vm362_vm7 = vcmp.lt.s32.totalorder %v353_v43, 2048 }
  0x3d   :  { %v458_v55 = vpop.eup %457  ;;  %v272_v58 = vmul.f32 0.6931472, %v456_v50  ;;  %v261_v13 = vmax.f32 %v252_v56, -100.0 }
  0x3e   :  { %v460_v60 = vpop.eup %459  ;;  %v274_v63 = vmul.f32 0.6931472, %v458_v55  ;;  %v262_v19 = vmax.f32 %v254_v61, -100.0 }
  0x3f   :  { %v462_v0 = vpop.eup %461  ;;  %v276_v3 = vmul.f32 0.6931472, %v460_v60  ;;  %v287_v4 = vmax.f32 %v272_v58, -100.0 }
  0x40   :  { %v464_v5 = vpop.eup %463  ;;  %v278_v9 = vmul.f32 0.6931472, %v462_v0  ;;  %v288_v10 = vmax.f32 %v274_v63, -100.0 }
  0x41   :  { %v466_v11 = vpop.eup %465  ;;  %v280_v14 = vmul.f32 0.6931472, %v464_v5  ;;  %v289_v15 = vmax.f32 %v276_v3, -100.0  ;;  %v295_v16 = vsub.f32 %v255_v57, %v287_v4 }
  0x42   :  { %v468_v17 = vpop.eup %467  ;;  %v282_v20 = vmul.f32 0.6931472, %v466_v11  ;;  %v290_v21 = vmax.f32 %v278_v9, -100.0  ;;  %v296_v22 = vsub.f32 %v256_v62, %v288_v10 }
  0x43   :  { %v470_v23 = vpop.eup %469  ;;  %v284_v25 = vmul.f32 0.6931472, %v468_v17  ;;  %v291_v27 = vmax.f32 %v280_v14, -100.0  ;;  %v297_v29 = vsub.f32 %v257_v1, %v289_v15  ;;  %v303_v30 = vmul.f32 %v295_v16, %v231_v6 }
  0x44   :  { %v286_v32 = vmul.f32 0.6931472, %v470_v23  ;;  %v292_v33 = vmax.f32 %v282_v20, -100.0  ;;  %v298_v34 = vsub.f32 %v258_v2, %v290_v21  ;;  %v304_v35 = vmul.f32 %v296_v22, %v232_v12 }
  0x45   :  { %v293_v37 = vmax.f32 %v284_v25, -100.0  ;;  %v299_v38 = vsub.f32 %v259_v7, %v291_v27  ;;  %v305_v39 = vmul.f32 %v297_v29, %v233_v18  ;;  %v311_v40 = vadd.f32 %v303_v30, %v287_v4 }
  0x46   :  { %v294_v45 = vmax.f32 %v286_v32, -100.0  ;;  %v300_v46 = vsub.f32 %v260_v8, %v292_v33  ;;  %v306_v47 = vmul.f32 %v298_v34, %v234_v24  ;;  %v312_v50 = vadd.f32 %v304_v35, %v288_v10 }
  0x47   :  { %v301_v52 = vsub.f32 %v261_v13, %v293_v37  ;;  %v307_v55 = vmul.f32 %v299_v38, %v235_v31  ;;  %v313_v56 = vadd.f32 %v305_v39, %v289_v15  ;;  %v319_v57 = vsub.f32 0.0, %v311_v40 }
  0x48   :  { %v302_v58 = vsub.f32 %v262_v19, %v294_v45  ;;  %v308_v60 = vmul.f32 %v300_v46, %v236_v36  ;;  %v314_v61 = vadd.f32 %v306_v47, %v290_v21  ;;  %v320_v62 = vsub.f32 0.0, %v312_v50 }
  0x49   :  { %v309_v63 = vmul.f32 %v301_v52, %v237_v41  ;;  %v315_v0 = vadd.f32 %v307_v55, %v291_v27  ;;  %v321_v1 = vsub.f32 0.0, %v313_v56  ;;  %v363_v2 = vsel %vm355_vm0, %v319_v57, 0.0 }
  0x4a   :  { %v310_v3 = vmul.f32 %v302_v58, %v238_v51  ;;  %v316_v4 = vadd.f32 %v308_v60, %v292_v33  ;;  %v322_v5 = vsub.f32 0.0, %v314_v61  ;;  %v364_v6 = vsel %vm356_vm1, %v320_v62, 0.0 }
  0x4b   :  { %v317_v7 = vadd.f32 %v309_v63, %v293_v37  ;;  %v323_v8 = vsub.f32 0.0, %v315_v0  ;;  %v365_v9 = vsel %vm357_vm2, %v321_v1, 0.0  ;;  %v400_v10 = vadd.f32 %v364_v6, %v363_v2 }
  0x4c   :  { %v318_v11 = vadd.f32 %v310_v3, %v294_v45  ;;  %v324_v12 = vsub.f32 0.0, %v316_v4  ;;  %v366_v13 = vsel %vm358_vm3, %v322_v5, 0.0 }
  0x4d   :  { %v402_v14 = vadd.f32 %v400_v10, %v365_v9  ;;  %v325_v44 = vsub.f32 0.0, %v317_v7  ;;  %v367_v15 = vsel %vm359_vm4, %v323_v8, 0.0 }
  0x4e   :  { %v326_v16 = vsub.f32 0.0, %v318_v11  ;;  %v368_v17 = vsel %vm360_vm5, %v324_v12, 0.0 }
  0x4f   :  { %v404_v48 = vadd.f32 %v402_v14, %v366_v13  ;;  %v369_v49 = vsel %vm361_vm6, %v325_v44, 0.0 }
  0x50   :  { %v370_v20 = vsel %vm362_vm7, %v326_v16, 0.0 }
  0x51   :  { %v406_v18 = vadd.f32 %v404_v48, %v367_v15 }
  0x53   :  { %v408_v19 = vadd.f32 %v406_v18, %v368_v17 }
  0x55   :  { %v410_v26 = vadd.f32 %v408_v19, %v369_v49 }
  0x57   :  { %v412_v28 = vadd.f32 %v410_v26, %v370_v20 }
  0x59   :  { %413 = vst [vmem:[#allocation8] sm:$0xff] %v412_v28 }
  0x5a   :  { %526 = shalt.err (!%p523_p6)
}
  0x5b   :  { %s527_s12 = scalar_lea.hbm %s647_s2, 128 }
  0x5c   :  { %p528_p7 = scmp.ne.s32.totalorder %s647_s2, %s527_s12  ;;  %p531_p8 = scmp.lt.u32.totalorder %s527_s12, %s647_s2 }
  0x5e   :  { %p533_p9 = pnand %p531_p8, %p528_p7 }
  0x60   :  { %536 = shalt.err (!%p533_p9)
}
  0x61   :  { %423 = dma.vmem_to_hbm [thread:$0]  %s421_s8, 128, %s647_s2, [#allocation5]  }
  0x62   :  { %541 = dma.done.wait [#allocation5], 128  }
  0x63   :  { %542 = vsyncadd [#allocation5], 4294967168 }
  0x64   :  { %427 = vsyncpa [#allocation4], 1 }
  0x65   :  { %428 = vsyncpa [#allocation7], 1 }
  0x66   :  { %429 = vsyncpa [#allocation5], 1 }

</bundles_post_ra>
